<compile_context>
chip_gen: v7x
topology: tpu7x:2x2x1
jax: 0.10.0
libtpu: 0.0.40
codegen_flags: <defaults>
</compile_context>

<pallas_src>
import functools

import jax
import jax.numpy as jnp
from jax import lax
from jax.experimental import pallas as pl
from jax.experimental.pallas import tpu as pltpu

SMOOTH = 1e-5
LANES = 128
SUB = 8


def _make_kernel(C, S, tr, chunk, n_chunks, spg):
    """Kernel over blocks of shape (1, C, tr, 128); accumulates (C, 8, 128) partials."""

    def kernel(pred_ref, gt_ref, num_ref, den_ref):
        s = pl.program_id(2)

        @pl.when(s == 0)
        def _init():
            num_ref[...] = jnp.zeros_like(num_ref)
            den_ref[...] = jnp.zeros_like(den_ref)

        # Logical (un-clamped) row offset of this block: used for the validity
        # mask so clamped/overhanging blocks contribute exactly zero.
        blk = pl.program_id(1) * spg + s
        base_row = blk * tr

        # Hoisted iotas (int32); flat index fits int32 for volumes < 2^31 voxels.
        row_iota = lax.broadcasted_iota(jnp.int32, (chunk, LANES), 0)
        lane_iota = lax.broadcasted_iota(jnp.int32, (chunk, LANES), 1)

        def do_chunk(j, carry):
            accs = list(carry)                       # 2*C arrays of (8, 128) f32
            r0 = j * chunk
            if not isinstance(r0, int):
                r0 = pl.multiple_of(r0, SUB)

            flat = (base_row + r0 + row_iota) * LANES + lane_iota
            valid = flat < S

            preds = [pred_ref[0, c, pl.ds(r0, chunk), :].astype(jnp.float32)
                     for c in range(C)]
            gts = [gt_ref[0, c, pl.ds(r0, chunk), :].astype(jnp.float32)
                   for c in range(C)]

            # Softmax over the channel axis, statically unrolled (C is tiny):
            # stays in VPU/EUP elementwise slots on lane-dense (chunk, 128) slabs.
            m = preds[0]
            for c in range(1, C):
                m = jnp.maximum(m, preds[c])
            es = [jnp.exp(preds[c] - m) for c in range(C)]
            ssum = es[0]
            for c in range(1, C):
                ssum = ssum + es[c]
            inv = pl.reciprocal(ssum, approx=False)

            for c in range(C):
                p_c = es[c] * inv
                numc = jnp.where(valid, gts[c] * p_c, 0.0)
                denc = jnp.where(valid, gts[c] + p_c, 0.0)
                # (chunk,128) -> (8,128): sum over the major axis (VALU adds only).
                accs[c] = accs[c] + numc.reshape(chunk // SUB, SUB, LANES).sum(axis=0)
                accs[C + c] = accs[C + c] + denc.reshape(chunk // SUB, SUB, LANES).sum(axis=0)
            return tuple(accs)

        init = tuple(jnp.zeros((SUB, LANES), jnp.float32) for _ in range(2 * C))
        if n_chunks == 1:
            accs = do_chunk(0, init)
        else:
            accs = lax.fori_loop(0, n_chunks, do_chunk, init)

        # Accumulate into the resident output block (same block across the s axis).
        for c in range(C):
            num_ref[0, 0, c] += accs[c]
            den_ref[0, 0, c] += accs[C + c]

    return kernel


def dice_gen_coef(y_pred, y_gt, *, target_block_bytes=4 << 20, chunk_rows=512,
                  interpret=False):
    """y_pred, y_gt: [N, C, D, H, W] -> gen_dice_coef: [C]."""
    N, C, D, H, W = y_pred.shape
    assert y_gt.shape == y_pred.shape
    S = D * H * W

    # ---- lane-dense spatial view [N, C, rows_v, 128] ----
    rows_v = max(pl.cdiv(S, LANES), SUB)          # at least 8 sublane rows
    S_view = rows_v * LANES

    pred = y_pred.reshape(N, C, S)
    gt = y_gt.reshape(N, C, S)
    if S_view != S:
        # Rare path (S % 128 != 0 or S < 1024): single fused pad+reshape
        # relayout pass; the padded tail is ignored in-kernel by the mask.
        pred = jnp.pad(pred, ((0, 0), (0, 0), (0, S_view - S)))
        gt = jnp.pad(gt, ((0, 0), (0, 0), (0, S_view - S)))
    pred = pred.reshape(N, C, rows_v, LANES)
    gt = gt.reshape(N, C, rows_v, LANES)

    # ---- block sizing: big DMA blocks, bounded compute sub-slabs ----
    itemsize = max(pred.dtype.itemsize, gt.dtype.itemsize)
    row_bytes = C * LANES * itemsize
    chunk = max(SUB, (min(chunk_rows, rows_v) // SUB) * SUB)          # multiple of 8
    tr = max(chunk, (target_block_bytes // row_bytes) // chunk * chunk)
    if tr >= rows_v:
        tr = pl.cdiv(rows_v, chunk) * chunk       # cover everything in one block
    n_sblocks = pl.cdiv(rows_v, tr)
    n_chunks = tr // chunk

    # Spatial-group split so both v7x TensorCores get work when N is 1 / odd.
    groups = 2 if (N % 2 != 0 and n_sblocks > 1) else 1
    spg = pl.cdiv(n_sblocks, groups)

    kernel = _make_kernel(C, S, tr, chunk, n_chunks, spg)

    def in_map(n, g, s):
        # Clamp fully out-of-range logical blocks to a valid one; the in-kernel
        # mask (built from the *logical* index) zeroes their contribution.
        return (n, 0, jnp.minimum(g * spg + s, n_sblocks - 1), 0)

    def out_map(n, g, s):
        return (n, g, 0, 0, 0)

    # VMEM budget: 2 inputs x 2 buffers x (C*tr*128*itemsize) <= ~16 MiB at the
    # 4 MiB target, plus ~2-3 MiB of chunked softmax temporaries -> 32 MiB limit
    # is safe on v5e/v6e/v7x.
    num_part, den_part = pl.pallas_call(
        kernel,
        out_shape=(
            jax.ShapeDtypeStruct((N, groups, C, SUB, LANES), jnp.float32),
            jax.ShapeDtypeStruct((N, groups, C, SUB, LANES), jnp.float32),
        ),
        grid_spec=pltpu.PrefetchScalarGridSpec(
            num_scalar_prefetch=0,
            grid=(N, groups, spg),
            in_specs=[
                pl.BlockSpec((1, C, tr, LANES), in_map),
                pl.BlockSpec((1, C, tr, LANES), in_map),
            ],
            out_specs=[
                pl.BlockSpec((1, 1, C, SUB, LANES), out_map),
                pl.BlockSpec((1, 1, C, SUB, LANES), out_map),
            ],
        ),
        compiler_params=pltpu.CompilerParams(
            dimension_semantics=("parallel", "parallel", "arbitrary"),
            vmem_limit_bytes=32 * 1024 * 1024,
        ),
        interpret=interpret,
    )(pred, gt)

    num = jnp.sum(num_part, axis=(1, 3, 4))          # (N, C)
    den = jnp.sum(den_part, axis=(1, 3, 4))          # (N, C)
    gd = 2.0 * (num + SMOOTH) / (den + SMOOTH)       # (N, C)
    return jnp.mean(gd, axis=0)                      # (C,)


def _reference(y_pred, y_gt):
    p = jax.nn.softmax(y_pred.astype(jnp.float32), axis=1)
    g = y_gt.astype(jnp.float32)
    num = jnp.sum(g * p, axis=(2, 3, 4))
    den = jnp.sum(g + p, axis=(2, 3, 4))
    return jnp.mean(2.0 * (num + SMOOTH) / (den + SMOOTH), axis=0)


def _make_inputs(key, N, C, D, H, W):
    k1, k2 = jax.random.split(key)
    y_pred = jax.random.normal(k1, (N, C, D, H, W), dtype=jnp.float32)
    labels = jax.random.randint(k2, (N, D, H, W), 0, C)
    y_gt = jnp.transpose(jax.nn.one_hot(labels, C, dtype=jnp.float32),
                         (0, 4, 1, 2, 3))            # NCDHW one-hot
    return y_pred, y_gt


if __name__ == "__main__":
    # weight_loss=[1,1,1] in __init__ implies C=3 classes (weight unused in forward).
    C = 3

    # 1) Primary small case: S = 1024 -> 8 rows x 128 lanes, no padding, N=2.
    yp, yg = _make_inputs(jax.random.PRNGKey(0), 2, C, 4, 16, 16)
    out = jax.block_until_ready(dice_gen_coef(yp, yg))
    ref = jax.block_until_ready(_reference(yp, yg))
    assert out.shape == (C,)
    assert jnp.allclose(out, ref, rtol=2e-5, atol=1e-6), (out, ref)

    # 2) Multi-block path: inner fori_loop chunking, spatial-group split (N=1),
    #    clamped out-of-range block + overhang masking.
    yp2, yg2 = _make_inputs(jax.random.PRNGKey(1), 1, C, 8, 96, 96)
    out2 = jax.block_until_ready(
        dice_gen_coef(yp2, yg2, target_block_bytes=256 * C * LANES * 4,
                      chunk_rows=64))
    ref2 = jax.block_until_ready(_reference(yp2, yg2))
    assert jnp.allclose(out2, ref2, rtol=2e-5, atol=1e-6), (out2, ref2)

    # 3) Ragged spatial size (S % 128 != 0): pad-to-view + in-kernel tail mask.
    yp3, yg3 = _make_inputs(jax.random.PRNGKey(2), 2, C, 3, 7, 9)
    out3 = jax.block_until_ready(dice_gen_coef(yp3, yg3))
    ref3 = jax.block_until_ready(_reference(yp3, yg3))
    assert jnp.allclose(out3, ref3, rtol=2e-5, atol=1e-6), (out3, ref3)

    print("KERNEL_OK")
</pallas_src>

<mosaic_0001>
module attributes {stable_mosaic.version = 11 : i64} {
  func.func @kernel(%arg0: i32, %arg1: i32, %arg2: i32, %arg3: memref<1x3x8x128xf32, #tpu.memory_space<vmem>>, %arg4: memref<1x3x8x128xf32, #tpu.memory_space<vmem>>, %arg5: memref<1x1x3x8x128xf32, #tpu.memory_space<vmem>>, %arg6: memref<1x1x3x8x128xf32, #tpu.memory_space<vmem>>) attributes {dimension_semantics = [#tpu.dimension_semantics<parallel>, #tpu.dimension_semantics<parallel>, #tpu.dimension_semantics<arbitrary>], iteration_bounds = array<i64: 2, 1, 1>, scalar_prefetch = 0 : i64, scratch_operands = 0 : i64, tpu.core_type = #tpu.core_type<tc>, window_params = [{transform_indices = @transform_0, window_bounds = array<i64: 1, 3, 8, 128>}, {transform_indices = @transform_1, window_bounds = array<i64: 1, 3, 8, 128>}, {transform_indices = @transform_2, window_bounds = array<i64: 1, 1, 3, 8, 128>}, {transform_indices = @transform_3, window_bounds = array<i64: 1, 1, 3, 8, 128>}]} {
    %c0_i32 = arith.constant 0 : i32
    %0 = arith.cmpi eq, %arg2, %c0_i32 : i32
    %1 = arith.extui %0 : i1 to i32
    %c0_i32_0 = arith.constant 0 : i32
    %2 = arith.cmpi ne, %1, %c0_i32_0 : i32
    scf.if %2 {
      %cst_100 = arith.constant 0.000000e+00 : f32
      %120 = vector.broadcast %cst_100 : f32 to vector<1x1x3x8x128xf32>
      %c0_101 = arith.constant 0 : index
      %c0_102 = arith.constant 0 : index
      %c0_103 = arith.constant 0 : index
      %c0_104 = arith.constant 0 : index
      %c0_105 = arith.constant 0 : index
      %121 = vector.load %arg5[%c0_101, %c0_102, %c0_103, %c0_104, %c0_105] : memref<1x1x3x8x128xf32, #tpu.memory_space<vmem>>, vector<1x1x3x8x128xf32>
      tpu.vector_store %arg5[%c0_101, %c0_102, %c0_103, %c0_104, %c0_105], %120 {strides = array<i32>} : memref<1x1x3x8x128xf32, #tpu.memory_space<vmem>>, vector<1x1x3x8x128xf32>,
      %cst_106 = arith.constant 0.000000e+00 : f32
      %122 = vector.broadcast %cst_106 : f32 to vector<1x1x3x8x128xf32>
      %c0_107 = arith.constant 0 : index
      %c0_108 = arith.constant 0 : index
      %c0_109 = arith.constant 0 : index
      %c0_110 = arith.constant 0 : index
      %c0_111 = arith.constant 0 : index
      %123 = vector.load %arg6[%c0_107, %c0_108, %c0_109, %c0_110, %c0_111] : memref<1x1x3x8x128xf32, #tpu.memory_space<vmem>>, vector<1x1x3x8x128xf32>
      tpu.vector_store %arg6[%c0_107, %c0_108, %c0_109, %c0_110, %c0_111], %122 {strides = array<i32>} : memref<1x1x3x8x128xf32, #tpu.memory_space<vmem>>, vector<1x1x3x8x128xf32>,
    } else {
    }
    %c1_i32 = arith.constant 1 : i32
    %3 = arith.muli %arg1, %c1_i32 : i32
    %4 = arith.addi %3, %arg2 : i32
    %c8_i32 = arith.constant 8 : i32
    %5 = arith.muli %4, %c8_i32 : i32
    %6 = tpu.iota {dimensions = array<i32: 0>} : vector<8x128xi32>
    %7 = tpu.iota {dimensions = array<i32: 1>} : vector<8x128xi32>
    %cst = arith.constant 0.000000e+00 : f32
    %8 = vector.broadcast %cst : f32 to vector<8x128xf32>
    %cst_1 = arith.constant 0.000000e+00 : f32
    %9 = vector.broadcast %cst_1 : f32 to vector<8x128xf32>
    %cst_2 = arith.constant 0.000000e+00 : f32
    %10 = vector.broadcast %cst_2 : f32 to vector<8x128xf32>
    %cst_3 = arith.constant 0.000000e+00 : f32
    %11 = vector.broadcast %cst_3 : f32 to vector<8x128xf32>
    %cst_4 = arith.constant 0.000000e+00 : f32
    %12 = vector.broadcast %cst_4 : f32 to vector<8x128xf32>
    %cst_5 = arith.constant 0.000000e+00 : f32
    %13 = vector.broadcast %cst_5 : f32 to vector<8x128xf32>
    %c0_i32_6 = arith.constant 0 : i32
    %14 = arith.addi %5, %c0_i32_6 : i32
    %15 = vector.broadcast %14 : i32 to vector<8x128xi32>
    %16 = arith.addi %15, %6 : vector<8x128xi32>
    %c128_i32 = arith.constant 128 : i32
    %17 = vector.broadcast %c128_i32 : i32 to vector<8x128xi32>
    %18 = arith.muli %16, %17 : vector<8x128xi32>
    %19 = arith.addi %18, %7 : vector<8x128xi32>
    %c1024_i32 = arith.constant 1024 : i32
    %20 = vector.broadcast %c1024_i32 : i32 to vector<8x128xi32>
    %21 = arith.cmpi slt, %19, %20 : vector<8x128xi32>
    %c0 = arith.constant 0 : index
    %c0_7 = arith.constant 0 : index
    %c0_8 = arith.constant 0 : index
    %c0_9 = arith.constant 0 : index
    %22 = vector.load %arg3[%c0, %c0_7, %c0_8, %c0_9] : memref<1x3x8x128xf32, #tpu.memory_space<vmem>>, vector<1x1x8x128xf32>
    %23 = vector.shape_cast %22 : vector<1x1x8x128xf32> to vector<8x128xf32>
    %c0_10 = arith.constant 0 : index
    %c1 = arith.constant 1 : index
    %c0_11 = arith.constant 0 : index
    %c0_12 = arith.constant 0 : index
    %24 = vector.load %arg3[%c0_10, %c1, %c0_11, %c0_12] : memref<1x3x8x128xf32, #tpu.memory_space<vmem>>, vector<1x1x8x128xf32>
    %25 = vector.shape_cast %24 : vector<1x1x8x128xf32> to vector<8x128xf32>
    %c0_13 = arith.constant 0 : index
    %c2 = arith.constant 2 : index
    %c0_14 = arith.constant 0 : index
    %c0_15 = arith.constant 0 : index
    %26 = vector.load %arg3[%c0_13, %c2, %c0_14, %c0_15] : memref<1x3x8x128xf32, #tpu.memory_space<vmem>>, vector<1x1x8x128xf32>
    %27 = vector.shape_cast %26 : vector<1x1x8x128xf32> to vector<8x128xf32>
    %c0_16 = arith.constant 0 : index
    %c0_17 = arith.constant 0 : index
    %c0_18 = arith.constant 0 : index
    %c0_19 = arith.constant 0 : index
    %28 = vector.load %arg4[%c0_16, %c0_17, %c0_18, %c0_19] : memref<1x3x8x128xf32, #tpu.memory_space<vmem>>, vector<1x1x8x128xf32>
    %29 = vector.shape_cast %28 : vector<1x1x8x128xf32> to vector<8x128xf32>
    %c0_20 = arith.constant 0 : index
    %c1_21 = arith.constant 1 : index
    %c0_22 = arith.constant 0 : index
    %c0_23 = arith.constant 0 : index
    %30 = vector.load %arg4[%c0_20, %c1_21, %c0_22, %c0_23] : memref<1x3x8x128xf32, #tpu.memory_space<vmem>>, vector<1x1x8x128xf32>
    %31 = vector.shape_cast %30 : vector<1x1x8x128xf32> to vector<8x128xf32>
    %c0_24 = arith.constant 0 : index
    %c2_25 = arith.constant 2 : index
    %c0_26 = arith.constant 0 : index
    %c0_27 = arith.constant 0 : index
    %32 = vector.load %arg4[%c0_24, %c2_25, %c0_26, %c0_27] : memref<1x3x8x128xf32, #tpu.memory_space<vmem>>, vector<1x1x8x128xf32>
    %33 = vector.shape_cast %32 : vector<1x1x8x128xf32> to vector<8x128xf32>
    %34 = arith.maximumf %23, %25 : vector<8x128xf32>
    %35 = arith.maximumf %34, %27 : vector<8x128xf32>
    %36 = arith.subf %23, %35 : vector<8x128xf32>
    %37 = math.exp %36 : vector<8x128xf32>
    %38 = arith.subf %25, %35 : vector<8x128xf32>
    %39 = math.exp %38 : vector<8x128xf32>
    %40 = arith.subf %27, %35 : vector<8x128xf32>
    %41 = math.exp %40 : vector<8x128xf32>
    %42 = arith.addf %37, %39 : vector<8x128xf32>
    %43 = arith.addf %42, %41 : vector<8x128xf32>
    %44 = tpu.reciprocal %43 : vector<8x128xf32> -> vector<8x128xf32>
    %45 = arith.mulf %37, %44 : vector<8x128xf32>
    %46 = arith.mulf %29, %45 : vector<8x128xf32>
    %cst_28 = arith.constant 0.000000e+00 : f32
    %47 = vector.broadcast %cst_28 : f32 to vector<8x128xf32>
    %48 = arith.select %21, %46, %47 : vector<8x128xi1>, vector<8x128xf32>
    %49 = arith.addf %29, %45 : vector<8x128xf32>
    %cst_29 = arith.constant 0.000000e+00 : f32
    %50 = vector.broadcast %cst_29 : f32 to vector<8x128xf32>
    %51 = arith.select %21, %49, %50 : vector<8x128xi1>, vector<8x128xf32>
    %52 = vector.shape_cast %48 : vector<8x128xf32> to vector<1x8x128xf32>
    %cst_30 = arith.constant dense<0.000000e+00> : vector<8x128xf32>
    %53 = vector.multi_reduction <add>, %52, %cst_30 [0] : vector<1x8x128xf32> to vector<8x128xf32>
    %54 = arith.addf %8, %53 : vector<8x128xf32>
    %55 = vector.shape_cast %51 : vector<8x128xf32> to vector<1x8x128xf32>
    %cst_31 = arith.constant dense<0.000000e+00> : vector<8x128xf32>
    %56 = vector.multi_reduction <add>, %55, %cst_31 [0] : vector<1x8x128xf32> to vector<8x128xf32>
    %57 = arith.addf %11, %56 : vector<8x128xf32>
    %58 = arith.mulf %39, %44 : vector<8x128xf32>
    %59 = arith.mulf %31, %58 : vector<8x128xf32>
    %cst_32 = arith.constant 0.000000e+00 : f32
    %60 = vector.broadcast %cst_32 : f32 to vector<8x128xf32>
    %61 = arith.select %21, %59, %60 : vector<8x128xi1>, vector<8x128xf32>
    %62 = arith.addf %31, %58 : vector<8x128xf32>
    %cst_33 = arith.constant 0.000000e+00 : f32
    %63 = vector.broadcast %cst_33 : f32 to vector<8x128xf32>
    %64 = arith.select %21, %62, %63 : vector<8x128xi1>, vector<8x128xf32>
    %65 = vector.shape_cast %61 : vector<8x128xf32> to vector<1x8x128xf32>
    %cst_34 = arith.constant dense<0.000000e+00> : vector<8x128xf32>
    %66 = vector.multi_reduction <add>, %65, %cst_34 [0] : vector<1x8x128xf32> to vector<8x128xf32>
    %67 = arith.addf %9, %66 : vector<8x128xf32>
    %68 = vector.shape_cast %64 : vector<8x128xf32> to vector<1x8x128xf32>
    %cst_35 = arith.constant dense<0.000000e+00> : vector<8x128xf32>
    %69 = vector.multi_reduction <add>, %68, %cst_35 [0] : vector<1x8x128xf32> to vector<8x128xf32>
    %70 = arith.addf %12, %69 : vector<8x128xf32>
    %71 = arith.mulf %41, %44 : vector<8x128xf32>
    %72 = arith.mulf %33, %71 : vector<8x128xf32>
    %cst_36 = arith.constant 0.000000e+00 : f32
    %73 = vector.broadcast %cst_36 : f32 to vector<8x128xf32>
    %74 = arith.select %21, %72, %73 : vector<8x128xi1>, vector<8x128xf32>
    %75 = arith.addf %33, %71 : vector<8x128xf32>
    %cst_37 = arith.constant 0.000000e+00 : f32
    %76 = vector.broadcast %cst_37 : f32 to vector<8x128xf32>
    %77 = arith.select %21, %75, %76 : vector<8x128xi1>, vector<8x128xf32>
    %78 = vector.shape_cast %74 : vector<8x128xf32> to vector<1x8x128xf32>
    %cst_38 = arith.constant dense<0.000000e+00> : vector<8x128xf32>
    %79 = vector.multi_reduction <add>, %78, %cst_38 [0] : vector<1x8x128xf32> to vector<8x128xf32>
    %80 = arith.addf %10, %79 : vector<8x128xf32>
    %81 = vector.shape_cast %77 : vector<8x128xf32> to vector<1x8x128xf32>
    %cst_39 = arith.constant dense<0.000000e+00> : vector<8x128xf32>
    %82 = vector.multi_reduction <add>, %81, %cst_39 [0] : vector<1x8x128xf32> to vector<8x128xf32>
    %83 = arith.addf %13, %82 : vector<8x128xf32>
    %c0_40 = arith.constant 0 : index
    %c0_41 = arith.constant 0 : index
    %c0_42 = arith.constant 0 : index
    %c0_43 = arith.constant 0 : index
    %c0_44 = arith.constant 0 : index
    %84 = vector.load %arg5[%c0_40, %c0_41, %c0_42, %c0_43, %c0_44] : memref<1x1x3x8x128xf32, #tpu.memory_space<vmem>>, vector<1x1x1x8x128xf32>
    %85 = vector.shape_cast %84 : vector<1x1x1x8x128xf32> to vector<8x128xf32>
    %86 = arith.addf %85, %54 : vector<8x128xf32>
    %c0_45 = arith.constant 0 : index
    %c0_46 = arith.constant 0 : index
    %c0_47 = arith.constant 0 : index
    %c0_48 = arith.constant 0 : index
    %c0_49 = arith.constant 0 : index
    %87 = vector.load %arg5[%c0_45, %c0_46, %c0_47, %c0_48, %c0_49] : memref<1x1x3x8x128xf32, #tpu.memory_space<vmem>>, vector<1x1x1x8x128xf32>
    %88 = vector.shape_cast %87 : vector<1x1x1x8x128xf32> to vector<8x128xf32>
    %89 = vector.shape_cast %86 : vector<8x128xf32> to vector<1x1x1x8x128xf32>
    tpu.vector_store %arg5[%c0_45, %c0_46, %c0_47, %c0_48, %c0_49], %89 {strides = array<i32>} : memref<1x1x3x8x128xf32, #tpu.memory_space<vmem>>, vector<1x1x1x8x128xf32>,
    %c0_50 = arith.constant 0 : index
    %c0_51 = arith.constant 0 : index
    %c0_52 = arith.constant 0 : index
    %c0_53 = arith.constant 0 : index
    %c0_54 = arith.constant 0 : index
    %90 = vector.load %arg6[%c0_50, %c0_51, %c0_52, %c0_53, %c0_54] : memref<1x1x3x8x128xf32, #tpu.memory_space<vmem>>, vector<1x1x1x8x128xf32>
    %91 = vector.shape_cast %90 : vector<1x1x1x8x128xf32> to vector<8x128xf32>
    %92 = arith.addf %91, %57 : vector<8x128xf32>
    %c0_55 = arith.constant 0 : index
    %c0_56 = arith.constant 0 : index
    %c0_57 = arith.constant 0 : index
    %c0_58 = arith.constant 0 : index
    %c0_59 = arith.constant 0 : index
    %93 = vector.load %arg6[%c0_55, %c0_56, %c0_57, %c0_58, %c0_59] : memref<1x1x3x8x128xf32, #tpu.memory_space<vmem>>, vector<1x1x1x8x128xf32>
    %94 = vector.shape_cast %93 : vector<1x1x1x8x128xf32> to vector<8x128xf32>
    %95 = vector.shape_cast %92 : vector<8x128xf32> to vector<1x1x1x8x128xf32>
    tpu.vector_store %arg6[%c0_55, %c0_56, %c0_57, %c0_58, %c0_59], %95 {strides = array<i32>} : memref<1x1x3x8x128xf32, #tpu.memory_space<vmem>>, vector<1x1x1x8x128xf32>,
    %c0_60 = arith.constant 0 : index
    %c0_61 = arith.constant 0 : index
    %c1_62 = arith.constant 1 : index
    %c0_63 = arith.constant 0 : index
    %c0_64 = arith.constant 0 : index
    %96 = vector.load %arg5[%c0_60, %c0_61, %c1_62, %c0_63, %c0_64] : memref<1x1x3x8x128xf32, #tpu.memory_space<vmem>>, vector<1x1x1x8x128xf32>
    %97 = vector.shape_cast %96 : vector<1x1x1x8x128xf32> to vector<8x128xf32>
    %98 = arith.addf %97, %67 : vector<8x128xf32>
    %c0_65 = arith.constant 0 : index
    %c0_66 = arith.constant 0 : index
    %c1_67 = arith.constant 1 : index
    %c0_68 = arith.constant 0 : index
    %c0_69 = arith.constant 0 : index
    %99 = vector.load %arg5[%c0_65, %c0_66, %c1_67, %c0_68, %c0_69] : memref<1x1x3x8x128xf32, #tpu.memory_space<vmem>>, vector<1x1x1x8x128xf32>
    %100 = vector.shape_cast %99 : vector<1x1x1x8x128xf32> to vector<8x128xf32>
    %101 = vector.shape_cast %98 : vector<8x128xf32> to vector<1x1x1x8x128xf32>
    tpu.vector_store %arg5[%c0_65, %c0_66, %c1_67, %c0_68, %c0_69], %101 {strides = array<i32>} : memref<1x1x3x8x128xf32, #tpu.memory_space<vmem>>, vector<1x1x1x8x128xf32>,
    %c0_70 = arith.constant 0 : index
    %c0_71 = arith.constant 0 : index
    %c1_72 = arith.constant 1 : index
    %c0_73 = arith.constant 0 : index
    %c0_74 = arith.constant 0 : index
    %102 = vector.load %arg6[%c0_70, %c0_71, %c1_72, %c0_73, %c0_74] : memref<1x1x3x8x128xf32, #tpu.memory_space<vmem>>, vector<1x1x1x8x128xf32>
    %103 = vector.shape_cast %102 : vector<1x1x1x8x128xf32> to vector<8x128xf32>
    %104 = arith.addf %103, %70 : vector<8x128xf32>
    %c0_75 = arith.constant 0 : index
    %c0_76 = arith.constant 0 : index
    %c1_77 = arith.constant 1 : index
    %c0_78 = arith.constant 0 : index
    %c0_79 = arith.constant 0 : index
    %105 = vector.load %arg6[%c0_75, %c0_76, %c1_77, %c0_78, %c0_79] : memref<1x1x3x8x128xf32, #tpu.memory_space<vmem>>, vector<1x1x1x8x128xf32>
    %106 = vector.shape_cast %105 : vector<1x1x1x8x128xf32> to vector<8x128xf32>
    %107 = vector.shape_cast %104 : vector<8x128xf32> to vector<1x1x1x8x128xf32>
    tpu.vector_store %arg6[%c0_75, %c0_76, %c1_77, %c0_78, %c0_79], %107 {strides = array<i32>} : memref<1x1x3x8x128xf32, #tpu.memory_space<vmem>>, vector<1x1x1x8x128xf32>,
    %c0_80 = arith.constant 0 : index
    %c0_81 = arith.constant 0 : index
    %c2_82 = arith.constant 2 : index
    %c0_83 = arith.constant 0 : index
    %c0_84 = arith.constant 0 : index
    %108 = vector.load %arg5[%c0_80, %c0_81, %c2_82, %c0_83, %c0_84] : memref<1x1x3x8x128xf32, #tpu.memory_space<vmem>>, vector<1x1x1x8x128xf32>
    %109 = vector.shape_cast %108 : vector<1x1x1x8x128xf32> to vector<8x128xf32>
    %110 = arith.addf %109, %80 : vector<8x128xf32>
    %c0_85 = arith.constant 0 : index
    %c0_86 = arith.constant 0 : index
    %c2_87 = arith.constant 2 : index
    %c0_88 = arith.constant 0 : index
    %c0_89 = arith.constant 0 : index
    %111 = vector.load %arg5[%c0_85, %c0_86, %c2_87, %c0_88, %c0_89] : memref<1x1x3x8x128xf32, #tpu.memory_space<vmem>>, vector<1x1x1x8x128xf32>
    %112 = vector.shape_cast %111 : vector<1x1x1x8x128xf32> to vector<8x128xf32>
    %113 = vector.shape_cast %110 : vector<8x128xf32> to vector<1x1x1x8x128xf32>
    tpu.vector_store %arg5[%c0_85, %c0_86, %c2_87, %c0_88, %c0_89], %113 {strides = array<i32>} : memref<1x1x3x8x128xf32, #tpu.memory_space<vmem>>, vector<1x1x1x8x128xf32>,
    %c0_90 = arith.constant 0 : index
    %c0_91 = arith.constant 0 : index
    %c2_92 = arith.constant 2 : index
    %c0_93 = arith.constant 0 : index
    %c0_94 = arith.constant 0 : index
    %114 = vector.load %arg6[%c0_90, %c0_91, %c2_92, %c0_93, %c0_94] : memref<1x1x3x8x128xf32, #tpu.memory_space<vmem>>, vector<1x1x1x8x128xf32>
    %115 = vector.shape_cast %114 : vector<1x1x1x8x128xf32> to vector<8x128xf32>
    %116 = arith.addf %115, %83 : vector<8x128xf32>
    %c0_95 = arith.constant 0 : index
    %c0_96 = arith.constant 0 : index
    %c2_97 = arith.constant 2 : index
    %c0_98 = arith.constant 0 : index
    %c0_99 = arith.constant 0 : index
    %117 = vector.load %arg6[%c0_95, %c0_96, %c2_97, %c0_98, %c0_99] : memref<1x1x3x8x128xf32, #tpu.memory_space<vmem>>, vector<1x1x1x8x128xf32>
    %118 = vector.shape_cast %117 : vector<1x1x1x8x128xf32> to vector<8x128xf32>
    %119 = vector.shape_cast %116 : vector<8x128xf32> to vector<1x1x1x8x128xf32>
    tpu.vector_store %arg6[%c0_95, %c0_96, %c2_97, %c0_98, %c0_99], %119 {strides = array<i32>} : memref<1x1x3x8x128xf32, #tpu.memory_space<vmem>>, vector<1x1x1x8x128xf32>,
    return
  }
  func.func @transform_0(%arg0: i32, %arg1: i32, %arg2: i32) -> (i32, i32, i32, i32) {
    %c1_i32 = arith.constant 1 : i32
    %0 = arith.muli %arg1, %c1_i32 : i32
    %1 = arith.addi %0, %arg2 : i32
    %c0_i32 = arith.constant 0 : i32
    %2 = arith.minsi %1, %c0_i32 : i32
    %c0_i32_0 = arith.constant 0 : i32
    %c0_i32_1 = arith.constant 0 : i32
    %c0_i32_2 = arith.constant 0 : i32
    return %arg0, %c0_i32_0, %2, %c0_i32_1 : i32, i32, i32, i32
  }
  func.func @transform_1(%arg0: i32, %arg1: i32, %arg2: i32) -> (i32, i32, i32, i32) {
    %c1_i32 = arith.constant 1 : i32
    %0 = arith.muli %arg1, %c1_i32 : i32
    %1 = arith.addi %0, %arg2 : i32
    %c0_i32 = arith.constant 0 : i32
    %2 = arith.minsi %1, %c0_i32 : i32
    %c0_i32_0 = arith.constant 0 : i32
    %c0_i32_1 = arith.constant 0 : i32
    %c0_i32_2 = arith.constant 0 : i32
    return %arg0, %c0_i32_0, %2, %c0_i32_1 : i32, i32, i32, i32
  }
  func.func @transform_2(%arg0: i32, %arg1: i32, %arg2: i32) -> (i32, i32, i32, i32, i32) {
    %c0_i32 = arith.constant 0 : i32
    %c0_i32_0 = arith.constant 0 : i32
    %c0_i32_1 = arith.constant 0 : i32
    %c0_i32_2 = arith.constant 0 : i32
    return %arg0, %arg1, %c0_i32, %c0_i32_0, %c0_i32_1 : i32, i32, i32, i32, i32
  }
  func.func @transform_3(%arg0: i32, %arg1: i32, %arg2: i32) -> (i32, i32, i32, i32, i32) {
    %c0_i32 = arith.constant 0 : i32
    %c0_i32_0 = arith.constant 0 : i32
    %c0_i32_1 = arith.constant 0 : i32
    %c0_i32_2 = arith.constant 0 : i32
    return %arg0, %arg1, %c0_i32, %c0_i32_0, %c0_i32_1 : i32, i32, i32, i32, i32
  }
}

</mosaic_0001>

<bundles_post_ra>
// kernel: tpu_custom_call.1
= control target key start
LH: loop header
LB: loop body
LE: loop exit
PB: predicated region body
PF: predicated region fallthrough
CT: control target
= control target key end

     0   :  { %9 = vsyncpa [#allocation3], 0  ;;  %s1188_s0 = inlined_call_operand.hbm [shape: f32[2,3,8,128], index: 0, kind: input, shape index: {}]   ;;  %s1189_s1 = inlined_call_operand.hbm [shape: f32[2,3,8,128], index: 1, kind: input, shape index: {}]   ;;  %s1190_s2 = inlined_call_operand.hbm [shape: f32[2,1,3,8,128], index: 2, kind: output, shape index: {0}]   ;;  %s1191_s3 = inlined_call_operand.hbm [shape: f32[2,1,3,8,128], index: 3, kind: output, shape index: {1}]  }
   0x1   :  { %11 = vsyncpa [#allocation3 + $0x1], 0 }
   0x2   :  { %12 = vsyncpa [#allocation6], 0 }
   0x3   :  { %14 = vsyncpa [#allocation6 + $0x1], 0 }
   0x4   :  { %15 = vsyncpa [#allocation4], 0 }
   0x5   :  { %17 = vsyncpa [#allocation4 + $0x1], 0 }
   0x6   :  { %18 = vsyncpa [#allocation9], 0 }
   0x7   :  { %20 = vsyncpa [#allocation9 + $0x1], 0  ;;  %s898_s12 = smov 0   ;;  %s900_s13 = smov 0  }
   0x8   :  { %s902_s14 = smov 0   ;;  %s904_s15 = smov 0  }
   0x9   :  { %s906_s16 = smov 0   ;;  %s908_s17 = smov 0  }
   0xa LB: > { %s575_s18 = sadd.s32 4294967295, %s868_s17   ;;  %s576_s19 = sadd.s32 4294967294, %s868_s17   ;;  %s868_s17 = sphi %s908_s17, %s26_s17   ;;  %s864_s16 = sphi %s906_s16, %s1209_s16   ;;  %s860_s15 = sphi %s904_s15, %s1208_s15   ;;  %s856_s14 = sphi %s902_s14, %s1207_s14   ;;  %s852_s13 = sphi %s900_s13, %s1206_s13   ;;  %s848_s12 = sphi %s898_s12, %s1205_s12  }
   0xb   : > { %s45_s20 = sadd.s32 1, %s864_s16  ;;  %s60_s21 = sadd.s32 1, %s856_s14 }
   0xc   : > { %p47_p0 = scmp.ge.s32.totalorder %s45_s20, 2  ;;  %p67_p1 = scmp.ne.s32.totalorder %s856_s14, %s852_s13 }
   0xd   : > { %p68_p2 = scmp.eq.s32.totalorder %s868_s17, 0  ;;  %p73_p3 = scmp.ne.s32.totalorder %s852_s13, %s848_s12 }
   0xe   : > { %s1211_s20 = smov (%p47_p0, %s45_s20), 0  ;;  %p74_p5 = scmp.eq.s32.totalorder %s575_s18, 0 }
   0xf   : > { %p939_p4 = por %p68_p2, %p67_p1  ;;  %s55_s23 = ssub.s32 %s864_s16, %s1211_s20 }
  0x10   : > { %p133_p6 = scmp.eq.s32.totalorder %s575_s18, 1  ;;  %p58_p7 = scmp.eq.s32.totalorder %s55_s23, 0 }
  0x11   : > { %p945_p8 = por %p74_p5, %p73_p3  ;;  %p139_p10 = scmp.eq.s32.totalorder %s576_s19, 1 }
  0x12   : > { %p949_p9 = por %p133_p6, %p67_p1  ;;  %p627_p13 = scmp.lt.s32.totalorder %s868_s17, 2 }
  0x13   : > { %s1195_s24 = scalar_select %p945_p8, 1, 0 }
  0x14   : > { %s1196_s25 = scalar_select %p949_p9, 1, 0 }
  0x15   : > { %s954_s26 = scalar_select %p58_p7, %s856_s14, %s60_s21  }
  0x16   : > { %p956_p11 = por %p139_p10, %p73_p3  ;;  %s963_s28 = sand.u32 1, %s856_s14  }
  0x17   : > { %s598_s29 = smul.u32 24, %s963_s28  ;;  %p969_p0 = pnand %p627_p13, %p939_p4 }
  0x18   : > { %s1197_s27 = scalar_select %p956_p11, 1, 0 }
  0x19   : > { %s599_s30 = smul.u32 384, %s864_s16  ;;  %s191_s8 = scalar_lea.vmem [#allocation2], %s598_s29 }
  0x1a   : > { %s202_s9 = sshll.u32 %s191_s8, 4  ;;  %s188_s10 = scalar_lea.sflag [#allocation3], %s963_s28  ;;  %s982_s9 = int_to_ptr.vmem [resolvable:$true] %s202_s9 }
  0x1b   : > { %s978_s7 = scalar_lea.hbm %s1188_s0, %s599_s30  ;;  %p692_p3 = pneg %p969_p0 }
  0x1c   : > { %s690_s11 = scalar_lea.hbm %s978_s7, 384  ;;  %s695_s21 = scalar_lea.hbm %s1188_s0, 768 }
  0x1d   : > { %p691_p2 = scmp.ne.s32.totalorder %s978_s7, %s690_s11  ;;  %p696_p6 = scmp.lt.u32.totalorder %s978_s7, %s1188_s0 }
  0x1e   : > { %p697_p7 = scmp.lt.u32.totalorder %s695_s21, %s690_s11  ;;  %p699_p13 = scmp.lt.u32.totalorder %s690_s11, %s978_s7 }
  0x1f   : > { %p693_p4 = pnand %p692_p3, %p691_p2 }
  0x20   : > { %p698_p10 = por %p697_p7, %p696_p6 }
  0x21   : > { %p694_p5 = pneg %p693_p4 }
  0x22   : > { %p700_p12 = por %p699_p13, %p698_p10 }
  0x24   : > { %p701_p1 = pnand %p700_p12, %p694_p5 }
  0x26   : > { %704 = shalt.err (!%p701_p1)
}
  0x27   : > { %s705_s5 = scalar_lea.vmem %s982_s9, 384  ;;  %s870_s6 = smov [#allocation2]  }
  0x28   : > { %p706_p2 = scmp.ne.s32.totalorder %s982_s9, %s705_s5  ;;  %s710_s8 = sshll.u32 %s870_s6, 4  ;;  %s711_s8 = int_to_ptr.vmem [resolvable:$false] %s710_s8 }
  0x29   : > { %s712_s18 = scalar_lea.vmem %s711_s8, 768  ;;  %p713_p9 = scmp.lt.s32.totalorder %s982_s9, %s711_s8 }
  0x2a   : > { %p708_p4 = pnand %p706_p2, %p692_p3  ;;  %p714_p6 = scmp.lt.s32.totalorder %s712_s18, %s705_s5 }
  0x2c   : > { %p709_p11 = pneg %p708_p4  ;;  %p715_p7 = por %p714_p6, %p713_p9 }
  0x2e   : > { %p716_p10 = pnand %p715_p7, %p709_p11 }
  0x30   : > { %719 = shalt.err (!%p716_p10)
}
  0x31   : > { %s871_s11 = smov 128   ;;  %s872_s19 = smov 8  }
  0x32   : > { %616 = dma.hbm_to_vmem [thread:$0]  (!%p969_p0), %s978_s7, 384, %s982_s9, %s188_s10, %s871_s11, %s871_s11, %s872_s19  }
  0x33   : > { %p235_p9 = scmp.lt.s32.totalorder %s868_s17, 3  ;;  %s1022_s23 = scalar_lea.hbm %s1189_s1, %s599_s30 }
  0x34   : > { %p1199_p11 = scmp.ge.s32.totalorder %s868_s17, 1  ;;  %s216_s6 = scalar_lea.vmem [#allocation5], %s598_s29 }
  0x35   : > { %s227_s8 = sshll.u32 %s216_s6, 4  ;;  %s213_s7 = scalar_lea.sflag [#allocation6], %s963_s28  ;;  %s1032_s8 = int_to_ptr.vmem [resolvable:$true] %s227_s8 }
  0x36   : > { %p1026_p12 = pnand %p1199_p11, %p235_p9  ;;  %s720_s9 = scalar_lea.hbm %s1022_s23, 384 }
  0x37   : > { %p721_p1 = scmp.ne.s32.totalorder %s1022_s23, %s720_s9  ;;  %s725_s18 = scalar_lea.hbm %s1189_s1, 768 }
  0x38   : > { %p726_p2 = scmp.lt.u32.totalorder %s1022_s23, %s1189_s1  ;;  %p727_p4 = scmp.lt.u32.totalorder %s725_s18, %s720_s9 }
  0x39   : > { %p723_p5 = pnand %p721_p1, %p692_p3  ;;  %p729_p7 = scmp.lt.u32.totalorder %s720_s9, %s1022_s23 }
  0x3a   : > { %p728_p6 = por %p727_p4, %p726_p2 }
  0x3b   : > { %p724_p13 = pneg %p723_p5 }
  0x3c   : > { %p730_p10 = por %p729_p7, %p728_p6 }
  0x3e   : > { %p731_p9 = pnand %p730_p10, %p724_p13 }
  0x40   : > { %734 = shalt.err (!%p731_p9)
}
  0x41   : > { %s735_s29 = scalar_lea.vmem %s1032_s8, 384  ;;  %s873_s6 = smov [#allocation5]  }
  0x42   : > { %p736_p11 = scmp.ne.s32.totalorder %s1032_s8, %s735_s29  ;;  %s740_s30 = sshll.u32 %s873_s6, 4  ;;  %s741_s30 = int_to_ptr.vmem [resolvable:$false] %s740_s30 }
  0x43   : > { %s742_s10 = scalar_lea.vmem %s741_s30, 768  ;;  %p743_p8 = scmp.lt.s32.totalorder %s1032_s8, %s741_s30 }
  0x44   : > { %p738_p1 = pnand %p736_p11, %p692_p3  ;;  %p744_p2 = scmp.lt.s32.totalorder %s742_s10, %s735_s29 }
  0x46   : > { %p739_p5 = pneg %p738_p1  ;;  %p745_p4 = por %p744_p2, %p743_p8 }
  0x48   : > { %p746_p6 = pnand %p745_p4, %p739_p5 }
  0x4a   : > { %749 = shalt.err (!%p746_p6)
}
  0x4b   : > { %619 = dma.hbm_to_vmem [thread:$0]  (!%p969_p0), %s1022_s23, 384, %s1032_s8, %s213_s7, %s871_s11, %s871_s11, %s872_s19  }
  0x4c   : > { %239 = sbr.rel (%p1026_p12) target bundleno = 167 (0xa7), region = 28  ;;  %s1066_s9 = sand.u32 (!%p1026_p12), 1, %s852_s13  }
  0x4d   : > { %s1069_s18 = smul.u32 (!%p1026_p12), 24, %s1066_s9  ;;  %s242_s4 = scalar_lea.sflag (!%p1026_p12), [#allocation3], %s1066_s9 }
  0x4e   : > { %p1201_p8 = scmp.ne.s32.totalorder (!%p1026_p12), %s1195_s24, 0 }
  0x4f   : > { %s245_s21 = scalar_lea.vmem (!%p1026_p12), [#allocation2], %s1069_s18 }
  0x53   : > { %831 = dma.done.wait (%p1201_p8), %s242_s4, 384  }
  0x54   : > { %833 = vsyncadd (%p1201_p8), %s242_s4, 4294966912  ;;  %s251_s28 = scalar_lea.sflag [#allocation6], %s1066_s9  ;;  %s1079_s11 = scalar_lea.vmem [#allocation5], %s1069_s18 }
  0x55   : > { %835 = dma.done.wait (%p1201_p8), %s251_s28, 384  }
  0x56   : > { %837 = vsyncadd (%p1201_p8), %s251_s28, 4294966912  ;;  %v314_v0 = vld [vmem:[%s245_s21] sm:$0xff]  ;;  %v582_v1 = vld [vmem:[%s245_s21 + $0x8] sm:$0xff]  ;;  %v305_v14 = vlaneseq  ;;  %s603_s24 = smul.u32 384, %s860_s15  ;;  %s279_s19 = scalar_lea.vmem [#allocation7], %s1069_s18 }
  0x57   : > { %v583_v2 = vld [vmem:[%s245_s21 + $0x10] sm:$0xff]  ;;  %v324_v3 = vmax.f32 %v314_v0, %v582_v1  ;;  %v584_v23 = vld [vmem:[%s1079_s11 + $0x8] sm:$0xff]  ;;  %v585_v26 = vld [vmem:[%s1079_s11 + $0x10] sm:$0xff]  ;;  %s408_s23 = sshll.u32 %s279_s19, 4  ;;  %s286_s5 = scalar_lea.vmem [#allocation8], %s1069_s18  ;;  %s1102_s23 = int_to_ptr.vmem [resolvable:$true] %s408_s23 }
  0x58   : > { %v306_v17 = vshrl.u32 %v305_v14, 7  ;;  %v308_v18 = vand.u32 127, %v305_v14  ;;  %v319_v22 = vld [vmem:[%s1079_s11] sm:$0xff]  ;;  %s426_s8 = sshll.u32 %s286_s5, 4  ;;  %s1100_s22 = scalar_lea.hbm %s1190_s2, %s603_s24  ;;  %s1109_s8 = int_to_ptr.vmem [resolvable:$true] %s426_s8 }
  0x59   : > { %v325_v4 = vmax.f32 %v324_v3, %v583_v2  ;;  %s1107_s30 = scalar_lea.hbm %s1191_s3, %s603_s24  ;;  %s388_s10 = scalar_lea.sflag [#allocation4], %s1066_s9 }
  0x5a   : > { %v311_v19 = vmul.u32 128, %v306_v17  ;;  %s750_s18 = scalar_lea.vmem %s1102_s23, 384  ;;  %p1202_p3 = scmp.ne.s32.totalorder %s1196_s25, 0 }
  0x5b   : > { %v326_v5 = vsub.f32 %v314_v0, %v325_v4  ;;  %v329_v6 = vsub.f32 %v582_v1, %v325_v4  ;;  %v332_v7 = vsub.f32 %v583_v2, %v325_v4  ;;  %p751_p0 = scmp.ne.s32.totalorder %s1102_s23, %s750_s18  ;;  %s874_s4 = smov [#allocation7]  }
  0x5c   : > { %v312_v20 = vadd.s32 %v311_v19, %v308_v18  ;;  %s754_s21 = sshll.u32 %s874_s4, 4  ;;  %s755_s21 = int_to_ptr.vmem [resolvable:$false] %s754_s21 }
  0x5d   : > { %v327_v8 = vmul.f32 1.442695, %v326_v5  ;;  %v330_v9 = vmul.f32 1.442695, %v329_v6  ;;  %v333_v10 = vmul.f32 1.442695, %v332_v7  ;;  %p752_p12 = pnand %p751_p0, %p1202_p3  ;;  %p757_p7 = scmp.lt.s32.totalorder %s1102_s23, %s755_s21 }
  0x5e   : > { %vm313_vm0 = vcmp.lt.s32.totalorder %v312_v20, 1024  ;;  %s756_s28 = scalar_lea.vmem %s755_s21, 768 }
  0x5f   : > { %682 = vpow2.f32 %v327_v8  ;;  %p753_p13 = pneg %p752_p12  ;;  %p758_p10 = scmp.lt.s32.totalorder %s756_s28, %s750_s18 }
  0x60   : > { %684 = vpow2.f32 %v330_v9 }
  0x61   : > { %686 = vpow2.f32 %v333_v10  ;;  %p759_p9 = por %p758_p10, %p757_p7 }
  0x63   : > { %p760_p11 = pnand %p759_p9, %p753_p13 }
  0x69   : > { %v683_v11 = vpop.eup %682 }
  0x6a   : > { %v685_v12 = vpop.eup %684 }
  0x6b   : > { %v687_v13 = vpop.eup %686  ;;  %v335_v15 = vadd.f32 %v685_v12, %v683_v11 }
  0x6d   : > { %v336_v16 = vadd.f32 %v687_v13, %v335_v15 }
  0x6f   : > { %688 = vrcp.f32 %v336_v16 }
  0x79   : > { %v689_v21 = vpop.eup %688 }
  0x7a   : > { %v338_v24 = vmul.f32 %v689_v21, %v683_v11  ;;  %v347_v25 = vmul.f32 %v689_v21, %v685_v12  ;;  %v356_v27 = vmul.f32 %v689_v21, %v687_v13 }
  0x7c   : > { %v339_v28 = vmul.f32 %v338_v24, %v319_v22  ;;  %v341_v29 = vadd.f32 %v338_v24, %v319_v22  ;;  %v348_v30 = vmul.f32 %v584_v23, %v347_v25  ;;  %v350_v31 = vadd.f32 %v584_v23, %v347_v25 }
  0x7d   : > { %v357_v32 = vmul.f32 %v585_v26, %v356_v27  ;;  %v359_v33 = vadd.f32 %v585_v26, %v356_v27 }
  0x7e   : > { %v340_v34 = vsel %vm313_vm0, %v339_v28, 0.0  ;;  %v342_v35 = vsel %vm313_vm0, %v341_v29, 0.0  ;;  %v349_v36 = vsel %vm313_vm0, %v348_v30, 0.0  ;;  %v351_v37 = vsel %vm313_vm0, %v350_v31, 0.0 }
  0x7f   : > { %v358_v38 = vsel %vm313_vm0, %v357_v32, 0.0  ;;  %v360_v39 = vsel %vm313_vm0, %v359_v33, 0.0  ;;  %367 = vst [vmem:[%s279_s19] sm:$0xff] %v340_v34  ;;  %370 = vst [vmem:[%s286_s5] sm:$0xff] %v342_v35 }
  0x80   : > { %587 = vst [vmem:[%s279_s19 + $0x8] sm:$0xff] %v349_v36  ;;  %589 = vst [vmem:[%s286_s5 + $0x8] sm:$0xff] %v351_v37 }
  0x81   : > { %591 = vst [vmem:[%s279_s19 + $0x10] sm:$0xff] %v358_v38  ;;  %593 = vst [vmem:[%s286_s5 + $0x10] sm:$0xff] %v360_v39 }
  0x82   : > { %763 = shalt.err (!%p760_p11)
}
  0x83   : > { %s764_s11 = scalar_lea.hbm %s1100_s22, 384  ;;  %s768_s5 = scalar_lea.hbm %s1190_s2, 768 }
  0x84   : > { %p765_p1 = scmp.ne.s32.totalorder %s1100_s22, %s764_s11  ;;  %p769_p4 = scmp.lt.u32.totalorder %s1100_s22, %s1190_s2 }
  0x85   : > { %p770_p6 = scmp.lt.u32.totalorder %s768_s5, %s764_s11  ;;  %p772_p0 = scmp.lt.u32.totalorder %s764_s11, %s1100_s22 }
  0x86   : > { %p766_p5 = pnand %p765_p1, %p1202_p3 }
  0x87   : > { %p771_p8 = por %p770_p6, %p769_p4 }
  0x88   : > { %p767_p2 = pneg %p766_p5 }
  0x89   : > { %p773_p12 = por %p772_p0, %p771_p8 }
  0x8b   : > { %p774_p13 = pnand %p773_p12, %p767_p2 }
  0x8d   : > { %777 = shalt.err (!%p774_p13)
}
  0x8e   : > { %s875_s29 = smov 128   ;;  %s876_s6 = smov 8  }
  0x8f   : > { %609 = dma.vmem_to_hbm [thread:$0]  (%p1202_p3), %s1102_s23, 384, %s1100_s22, %s388_s10, %s875_s29, %s875_s29, %s876_s6  }
  0x90   : > { %s393_s18 = scalar_lea.sflag [#allocation9], %s1066_s9  ;;  %s778_s4 = scalar_lea.vmem %s1109_s8, 384 }
  0x91   : > { %p779_p7 = scmp.ne.s32.totalorder %s1109_s8, %s778_s4  ;;  %s877_s21 = smov [#allocation8]  }
  0x92   : > { %s782_s28 = sshll.u32 %s877_s21, 4  ;;  %s783_s28 = int_to_ptr.vmem [resolvable:$false] %s782_s28 }
  0x93   : > { %p780_p10 = pnand %p779_p7, %p1202_p3  ;;  %s784_s11 = scalar_lea.vmem %s783_s28, 768 }
  0x94   : > { %p785_p11 = scmp.lt.s32.totalorder %s1109_s8, %s783_s28  ;;  %p786_p1 = scmp.lt.s32.totalorder %s784_s11, %s778_s4 }
  0x95   : > { %p781_p9 = pneg %p780_p10 }
  0x96   : > { %p787_p5 = por %p786_p1, %p785_p11 }
  0x98   : > { %p788_p2 = pnand %p787_p5, %p781_p9 }
  0x9a   : > { %791 = shalt.err (!%p788_p2)
}
  0x9b   : > { %s792_s23 = scalar_lea.hbm %s1107_s30, 384  ;;  %s796_s24 = scalar_lea.hbm %s1191_s3, 768 }
  0x9c   : > { %p793_p4 = scmp.ne.s32.totalorder %s1107_s30, %s792_s23  ;;  %p797_p0 = scmp.lt.u32.totalorder %s1107_s30, %s1191_s3 }
  0x9d   : > { %p798_p12 = scmp.lt.u32.totalorder %s796_s24, %s792_s23  ;;  %p800_p7 = scmp.lt.u32.totalorder %s792_s23, %s1107_s30 }
  0x9e   : > { %p794_p6 = pnand %p793_p4, %p1202_p3 }
  0x9f   : > { %p799_p13 = por %p798_p12, %p797_p0 }
  0xa0   : > { %p795_p8 = pneg %p794_p6 }
  0xa1   : > { %p801_p10 = por %p800_p7, %p799_p13 }
  0xa3   : > { %p802_p9 = pnand %p801_p10, %p795_p8 }
  0xa5   : > { %805 = shalt.err (!%p802_p9)
}
  0xa6   : > { %610 = dma.vmem_to_hbm [thread:$0]  (%p1202_p3), %s1109_s8, 384, %s1107_s30, %s393_s18, %s875_s29, %s875_s29, %s876_s6  }
  0xa7 PF: > { %s441_s15 = sand.u32 1, %s848_s12   ;;  %p1203_p11 = scmp.ne.s32.totalorder %s1197_s27, 0 }
  0xa8   : > { %p1204_p1 = scmp.ge.s32.totalorder %s868_s17, 2  ;;  %s442_s7 = scalar_lea.sflag [#allocation4], %s441_s15 }
  0xaa   : > { %p621_p5 = pnand %p1204_p1, %p1203_p11 }
  0xac   : > { %839 = dma.done.wait (!%p621_p5), %s442_s7, 384  }
  0xad   : > { %841 = vsyncadd (!%p621_p5), %s442_s7, 4294966912  ;;  %s451_s25 = scalar_lea.sflag [#allocation9], %s441_s15 }
  0xae   : > { %843 = dma.done.wait (!%p621_p5), %s451_s25, 384  }
  0xaf   : > { %845 = vsyncadd (!%p621_p5), %s451_s25, 4294966912  ;;  %s26_s17 = sadd.s32 1, %s868_s17   ;;  %s1205_s12 = smov %s852_s13 }
  0xb0   : > { %p23_p2 = scmp.ge.s32.totalorder %s26_s17, 4   ;;  %s1206_s13 = smov %s856_s14 }
  0xb1   : > { %s1207_s14 = smov %s954_s26  ;;  %s1208_s15 = smov %s864_s16 }
  0xb2   : > { %s1209_s16 = smov %s1211_s20  ;;  %25 = sbr.rel (!%p23_p2) target bundleno = 10 (0xa), region = 115 }
  0xb9   :  { %456 = vsyncpa [#allocation3], 1 }
  0xba   :  { %458 = vsyncpa [#allocation3 + $0x1], 1 }
  0xbb   :  { %459 = vsyncpa [#allocation6], 1 }
  0xbc   :  { %461 = vsyncpa [#allocation6 + $0x1], 1 }
  0xbd   :  { %462 = vsyncpa [#allocation4], 1 }
  0xbe   :  { %464 = vsyncpa [#allocation4 + $0x1], 1 }
  0xbf   :  { %465 = vsyncpa [#allocation9], 1 }
  0xc0   :  { %467 = vsyncpa [#allocation9 + $0x1], 1 }

</bundles_post_ra>
